<compile_context>
chip_gen: v6e
topology: v6e:2x2x1
jax: 0.10.0
libtpu: 0.0.40
codegen_flags: <defaults>
</compile_context>

<pallas_src>
import functools

import numpy as np
import jax
import jax.numpy as jnp
from jax.experimental import pallas as pl
from jax.experimental.pallas import tpu as pltpu


# ----------------------------------------------------------------------------
# helpers
# ----------------------------------------------------------------------------
def _pick_tile_and_pad(N, max_tile):
    """Tile size (multiple of 128, <= max_tile) and padded N (multiple of tile)."""
    n128 = pl.cdiv(N, 128) * 128
    g = pl.cdiv(n128, max_tile)
    tile = pl.cdiv(pl.cdiv(n128, g), 128) * 128
    return g * tile, tile


def _pad_last(a, target):
    pad = target - a.shape[-1]
    if pad == 0:
        return a
    cfg = [(0, 0)] * (a.ndim - 1) + [(0, pad)]
    return jnp.pad(a, cfg)


def _compiler_params(semantics, working_set_bytes):
    # Explicit VMEM budget: generous margin, but never above v7x's 64 MiB.
    vmem = int(min(64 << 20, max(16 << 20, 4 * working_set_bytes)))
    return pltpu.CompilerParams(dimension_semantics=semantics,
                                vmem_limit_bytes=vmem)


# ----------------------------------------------------------------------------
# Kernel 1: encoder matmul + bandwidth head
#   encoded = x @ W_enc.T                         (B, n)
#   bw      = a * sigmoid(encoded @ W_bw.T) + b   (B, n*m)
#   inv_bw2 = 1 / (bw * mu)^2                     (B, n*m)   (all decode needs)
# Grid reduces over N; the small outputs stay VMEM-resident across it.
# ----------------------------------------------------------------------------
def _encode_kernel(x_ref, wenc_ref, wbw_ref, enc_ref, ibw_ref, *, a, b, mu):
    k = pl.program_id(0)

    @pl.when(k == 0)
    def _():
        enc_ref[...] = jnp.zeros_like(enc_ref)

    # (B, tk) @ (tk, n) -> (B, n); weights pre-transposed, no per-step relayout.
    enc_ref[...] += jnp.dot(x_ref[...], wenc_ref[...],
                            preferred_element_type=jnp.float32)

    @pl.when(k == pl.num_programs(0) - 1)
    def _():
        # bandwidth head: (B, n) @ (n, n*m) -> (B, n*m)
        z = jnp.dot(enc_ref[...], wbw_ref[...],
                    preferred_element_type=jnp.float32)
        bw = a * jax.nn.sigmoid(z) + b
        # Emit 1/(band*mu)^2 directly; this is the only quantity decode needs.
        ibw_ref[...] = 1.0 / jnp.square(bw * mu)


def encode(x, w_enc_t, w_bw_t, mu, *, max_tk=8192):
    B, N = x.shape
    n = w_enc_t.shape[1]
    nm = w_bw_t.shape[1]
    Np, tk = _pick_tile_and_pad(N, max_tk)
    if Np != N:  # zero-padded columns contribute nothing to the dot
        x = _pad_last(x, Np)
        w_enc_t = jnp.pad(w_enc_t, ((0, Np - N), (0, 0)))

    a = 1.0 / 60.0 - 4.0 / 60.0 / mu
    b = 4.0 / 60.0 / mu
    kern = functools.partial(_encode_kernel, a=a, b=b, mu=mu)
    work = 4 * (2 * (B + n) * tk + n * nm + B * n + B * nm)
    return pl.pallas_call(
        kern,
        out_shape=(jax.ShapeDtypeStruct((B, n), jnp.float32),
                   jax.ShapeDtypeStruct((B, nm), jnp.float32)),
        grid_spec=pltpu.PrefetchScalarGridSpec(
            num_scalar_prefetch=0,
            grid=(Np // tk,),
            in_specs=[pl.BlockSpec((B, tk), lambda k: (0, k)),
                      pl.BlockSpec((tk, n), lambda k: (k, 0)),
                      pl.BlockSpec((n, nm), lambda k: (0, 0))],
            out_specs=[pl.BlockSpec((B, n), lambda k: (0, 0)),
                       pl.BlockSpec((B, nm), lambda k: (0, 0))]),
        compiler_params=_compiler_params(("arbitrary",), work),
    )(x, w_enc_t, w_bw_t)


# ----------------------------------------------------------------------------
# Kernel 2: bubble smoothing + final contraction, tiled over N (lane axis).
# For each column j (with c = clustering label of j):
#   inv_j   = 1 / (band[b,i,c] * mu)^2                (selected via one-hot)
#   win_k   = relu(1 - d_jk^2 * inv_j)
#   smooth  = sum_k basis[k,i,j] * win_k / sum_k win_k
#   out[b,j]= sum_i encoded[b,i] * smooth[b,i,j]
# ----------------------------------------------------------------------------
def _decode_kernel(enc_ref, ibw_ref, onehot_ref, dist2_ref, basis_ref,
                   out_ref, *, K, m):
    # Per-column 1/(band*mu)^2 selected by cluster label via one-hot (m small);
    # avoids materialising / streaming the (B, n, N) bandwidth gather from HBM.
    inv = ibw_ref[0] * onehot_ref[0, :][None, None, :]        # (B, n, tn)
    for c in range(1, m):
        inv = inv + ibw_ref[c] * onehot_ref[c, :][None, None, :]

    num = jnp.zeros_like(inv)
    den = jnp.zeros_like(inv)
    for k in range(K):                                        # K small & static
        w = jnp.maximum(1.0 - dist2_ref[k, :] * inv, 0.0)     # (B, n, tn)
        den = den + w
        num = num + basis_ref[k] * w                          # (n, tn) bcast B

    # Self-neighbour at distance 0 keeps den >= 1 (same assumption as torch).
    smoothed = num * pl.reciprocal(den, approx=True)
    enc = enc_ref[...]                                        # (B, n)
    out_ref[...] = jnp.sum(enc[:, :, None] * smoothed, axis=1)  # (B, tn)


def decode(enc, ibw, onehot, dist2, basis, *, max_tn=2048):
    B, n = enc.shape
    m = ibw.shape[0]
    K, N = dist2.shape
    Np, tn = _pick_tile_and_pad(N, max_tn)
    if Np != N:
        # Padded columns: all-zero one-hot -> inv=0 -> den=K, num=0 -> out=0.
        onehot = _pad_last(onehot, Np)
        dist2 = _pad_last(dist2, Np)
        basis = _pad_last(basis, Np)

    kern = functools.partial(_decode_kernel, K=K, m=m)
    work = 4 * (B * n + m * B * n + 2 * (m + K + K * n + B) * tn)
    out = pl.pallas_call(
        kern,
        out_shape=jax.ShapeDtypeStruct((B, Np), jnp.float32),
        grid_spec=pltpu.PrefetchScalarGridSpec(
            num_scalar_prefetch=0,
            grid=(Np // tn,),
            in_specs=[pl.BlockSpec((B, n), lambda j: (0, 0)),
                      pl.BlockSpec((m, B, n, 1), lambda j: (0, 0, 0, 0)),
                      pl.BlockSpec((m, tn), lambda j: (0, j)),
                      pl.BlockSpec((K, tn), lambda j: (0, j)),
                      pl.BlockSpec((K, n, tn), lambda j: (0, 0, j))],
            out_specs=pl.BlockSpec((B, tn), lambda j: (0, j))),
        compiler_params=_compiler_params(("parallel",), work),
    )(enc, ibw, onehot, dist2, basis)
    return out[:, :N] if Np != N else out


# ----------------------------------------------------------------------------
# Full EncoderDecoder.forward == NRBS.decode(NRBS.encode(x))
# ----------------------------------------------------------------------------
def nrbs_forward(x, w_enc, w_dec, w_bw, neighbour_id, neighbour_distance,
                 clustering_labels, mu):
    B, N = x.shape
    n = w_enc.shape[0]
    m = w_bw.shape[0] // n

    # Encoder + bandwidth head (weights pre-transposed once on the host).
    enc, inv_bw2 = encode(x, w_enc.T, w_bw.T, mu)             # (B,n), (B,n*m)

    # Tiny (m, B, n, 1) tensor replacing the (B, n, N) bandwidth gather.
    ibw = jnp.transpose(inv_bw2.reshape(B, n, m), (2, 0, 1))[..., None]

    onehot = (clustering_labels[None, :]
              == jnp.arange(m, dtype=clustering_labels.dtype)[:, None]
              ).astype(jnp.float32)                           # (m, N)
    dist2 = jnp.square(neighbour_distance).T                  # (K, N)
    # TODO(synk): the w_dec[:, neighbour_id] gather stays in XLA (data-dependent
    # gather); a DMA-gather kernel is possible but unnecessary at these sizes.
    basis = jnp.transpose(w_dec[:, neighbour_id], (2, 0, 1))  # (K, n, N)
    return decode(enc, ibw, onehot, dist2, basis)             # (B, N)


# Pure-JAX reference mirroring the PyTorch code, for verification.
def nrbs_reference(x, w_enc, w_dec, w_bw, neighbour_id, neighbour_distance,
                   clustering_labels, mu):
    B, N = x.shape
    n = w_enc.shape[0]
    m = w_bw.shape[0] // n
    enc = jnp.dot(x, w_enc.T, precision=jax.lax.Precision.HIGHEST)
    bw = jax.nn.sigmoid(
        jnp.dot(enc, w_bw.T, precision=jax.lax.Precision.HIGHEST))
    bw = (1.0 / 60.0 - 4.0 / 60.0 / mu) * bw + 4.0 / 60.0 / mu
    band = bw.reshape(B, n, m)[:, :, clustering_labels]       # (B, n, N)
    basis = w_dec[:, neighbour_id]                            # (n, N, K)
    d = neighbour_distance                                    # (N, K)
    window = jnp.maximum(
        1.0 - d[None, None] ** 2 / (band[..., None] * mu) ** 2, 0.0)
    window = window / jnp.sum(window, axis=-1, keepdims=True)
    smoothed = jnp.sum(basis[None] * window, axis=-1)         # (B, n, N)
    return jnp.einsum('bi,bin->bn', enc, smoothed,
                      precision=jax.lax.Precision.HIGHEST)


if __name__ == "__main__":
    # Small but TPU-friendly shapes implied by the module.
    N, n, m, K, B = 256, 8, 4, 8, 2
    mu = 5.0

    key = jax.random.PRNGKey(0)
    k1, k2, k3, k4, k5 = jax.random.split(key, 5)

    # Deterministic synthetic parameters (not a checkpoint load).
    x = jax.random.normal(k1, (B, N), jnp.float32) * 0.5
    w_enc = jax.random.normal(k2, (n, N), jnp.float32) / np.sqrt(N)
    w_dec = jax.random.normal(k3, (n, N), jnp.float32) / np.sqrt(N)
    w_bw = jax.random.normal(k4, (n * m, n), jnp.float32) / np.sqrt(n)

    # Synthetic neighbourhood: each node's K nearest = itself + next K-1.
    cols = np.arange(N)
    neighbour_id = jnp.asarray(
        (cols[:, None] + np.arange(K)[None, :]) % N, jnp.int32)      # (N, K)
    nd = jax.random.uniform(k5, (N, K), jnp.float32, 0.0, 0.06)
    neighbour_distance = nd.at[:, 0].set(0.0)                        # self at d=0
    clustering_labels = jnp.asarray(cols % m, jnp.int32)             # (N,)
    # group_indices of the torch code partition range(N); tiling over N replaces it.

    out = nrbs_forward(x, w_enc, w_dec, w_bw, neighbour_id,
                       neighbour_distance, clustering_labels, mu)
    out = jax.block_until_ready(out)

    ref = nrbs_reference(x, w_enc, w_dec, w_bw, neighbour_id,
                         neighbour_distance, clustering_labels, mu)
    np.testing.assert_allclose(np.asarray(out), np.asarray(ref),
                               rtol=2e-2, atol=2e-3)
    print("KERNEL_OK")
</pallas_src>

<mosaic_0001>
module attributes {stable_mosaic.version = 11 : i64} {
  func.func @_encode_kernel(%arg0: i32, %arg1: memref<2x256xf32, #tpu.memory_space<vmem>>, %arg2: memref<256x8xf32, #tpu.memory_space<vmem>>, %arg3: memref<8x32xf32, #tpu.memory_space<vmem>>, %arg4: memref<2x8xf32, #tpu.memory_space<vmem>>, %arg5: memref<2x32xf32, #tpu.memory_space<vmem>>) attributes {dimension_semantics = [#tpu.dimension_semantics<arbitrary>], iteration_bounds = array<i64: 1>, scalar_prefetch = 0 : i64, scratch_operands = 0 : i64, tpu.core_type = #tpu.core_type<tc>, window_params = [{transform_indices = @transform_0, window_bounds = array<i64: 2, 256>}, {transform_indices = @transform_1, window_bounds = array<i64: 256, 8>}, {pipeline_mode = #tpu.pipeline_mode<synchronous>, transform_indices = @transform_2, window_bounds = array<i64: 8, 32>}, {pipeline_mode = #tpu.pipeline_mode<synchronous>, transform_indices = @transform_3, window_bounds = array<i64: 2, 8>}, {pipeline_mode = #tpu.pipeline_mode<synchronous>, transform_indices = @transform_4, window_bounds = array<i64: 2, 32>}]} {
    %c0_i32 = arith.constant 0 : i32
    %0 = arith.cmpi eq, %arg0, %c0_i32 : i32
    %1 = arith.extui %0 : i1 to i32
    %c0_i32_0 = arith.constant 0 : i32
    %2 = arith.cmpi ne, %1, %c0_i32_0 : i32
    scf.if %2 {
      %cst_10 = arith.constant 0.000000e+00 : f32
      %12 = vector.broadcast %cst_10 : f32 to vector<2x8xf32>
      %c0_11 = arith.constant 0 : index
      %c0_12 = arith.constant 0 : index
      %13 = vector.load %arg4[%c0_11, %c0_12] : memref<2x8xf32, #tpu.memory_space<vmem>>, vector<2x8xf32>
      tpu.vector_store %arg4[%c0_11, %c0_12], %12 {strides = array<i32>} : memref<2x8xf32, #tpu.memory_space<vmem>>, vector<2x8xf32>,
    } else {
    }
    %c0 = arith.constant 0 : index
    %c0_1 = arith.constant 0 : index
    %3 = vector.load %arg4[%c0, %c0_1] : memref<2x8xf32, #tpu.memory_space<vmem>>, vector<2x8xf32>
    %c0_2 = arith.constant 0 : index
    %c0_3 = arith.constant 0 : index
    %4 = vector.load %arg1[%c0_2, %c0_3] : memref<2x256xf32, #tpu.memory_space<vmem>>, vector<2x256xf32>
    %c0_4 = arith.constant 0 : index
    %c0_5 = arith.constant 0 : index
    %5 = vector.load %arg2[%c0_4, %c0_5] : memref<256x8xf32, #tpu.memory_space<vmem>>, vector<256x8xf32>
    %cst = arith.constant dense<0.000000e+00> : vector<2x8xf32>
    %6 = tpu.matmul %4, %5, %cst {dimension_numbers = #tpu.dot_dimension_numbers<[1], [0], [0], [1], [0, 0, 1, 1], [], []>} : vector<2x256xf32>, vector<256x8xf32>, vector<2x8xf32> -> vector<2x8xf32>
    %7 = arith.addf %3, %6 : vector<2x8xf32>
    %c0_6 = arith.constant 0 : index
    %c0_7 = arith.constant 0 : index
    %8 = vector.load %arg4[%c0_6, %c0_7] : memref<2x8xf32, #tpu.memory_space<vmem>>, vector<2x8xf32>
    tpu.vector_store %arg4[%c0_6, %c0_7], %7 {strides = array<i32>} : memref<2x8xf32, #tpu.memory_space<vmem>>, vector<2x8xf32>,
    %c0_i32_8 = arith.constant 0 : i32
    %9 = arith.cmpi eq, %arg0, %c0_i32_8 : i32
    %10 = arith.extui %9 : i1 to i32
    %c0_i32_9 = arith.constant 0 : i32
    %11 = arith.cmpi ne, %10, %c0_i32_9 : i32
    scf.if %11 {
      %c0_10 = arith.constant 0 : index
      %c0_11 = arith.constant 0 : index
      %12 = vector.load %arg4[%c0_10, %c0_11] : memref<2x8xf32, #tpu.memory_space<vmem>>, vector<2x8xf32>
      %c0_12 = arith.constant 0 : index
      %c0_13 = arith.constant 0 : index
      %13 = vector.load %arg3[%c0_12, %c0_13] : memref<8x32xf32, #tpu.memory_space<vmem>>, vector<8x32xf32>
      %cst_14 = arith.constant dense<0.000000e+00> : vector<2x32xf32>
      %14 = tpu.matmul %12, %13, %cst_14 {dimension_numbers = #tpu.dot_dimension_numbers<[1], [0], [0], [1], [0, 0, 1, 1], [], []>} : vector<2x8xf32>, vector<8x32xf32>, vector<2x32xf32> -> vector<2x32xf32>
      %15 = arith.negf %14 : vector<2x32xf32>
      %16 = math.exp %15 : vector<2x32xf32>
      %cst_15 = arith.constant 1.000000e+00 : f32
      %17 = vector.broadcast %cst_15 : f32 to vector<2x32xf32>
      %18 = arith.addf %17, %16 : vector<2x32xf32>
      %19 = arith.divf %17, %18 : vector<2x32xf32>
      %cst_16 = arith.constant 0.00333333341 : f32
      %20 = vector.broadcast %cst_16 : f32 to vector<2x32xf32>
      %21 = arith.mulf %20, %19 : vector<2x32xf32>
      %cst_17 = arith.constant 0.0133333337 : f32
      %22 = vector.broadcast %cst_17 : f32 to vector<2x32xf32>
      %23 = arith.addf %21, %22 : vector<2x32xf32>
      %cst_18 = arith.constant 5.000000e+00 : f32
      %24 = vector.broadcast %cst_18 : f32 to vector<2x32xf32>
      %25 = arith.mulf %23, %24 : vector<2x32xf32>
      %26 = arith.mulf %25, %25 : vector<2x32xf32>
      %cst_19 = arith.constant 1.000000e+00 : f32
      %27 = vector.broadcast %cst_19 : f32 to vector<2x32xf32>
      %28 = arith.divf %27, %26 : vector<2x32xf32>
      %c0_20 = arith.constant 0 : index
      %c0_21 = arith.constant 0 : index
      %29 = vector.load %arg5[%c0_20, %c0_21] : memref<2x32xf32, #tpu.memory_space<vmem>>, vector<2x32xf32>
      tpu.vector_store %arg5[%c0_20, %c0_21], %28 {strides = array<i32>} : memref<2x32xf32, #tpu.memory_space<vmem>>, vector<2x32xf32>,
    } else {
    }
    return
  }
  func.func @transform_0(%arg0: i32) -> (i32, i32) {
    %c0_i32 = arith.constant 0 : i32
    %c0_i32_0 = arith.constant 0 : i32
    return %c0_i32, %arg0 : i32, i32
  }
  func.func @transform_1(%arg0: i32) -> (i32, i32) {
    %c0_i32 = arith.constant 0 : i32
    %c0_i32_0 = arith.constant 0 : i32
    return %arg0, %c0_i32 : i32, i32
  }
  func.func @transform_2(%arg0: i32) -> (i32, i32) {
    %c0_i32 = arith.constant 0 : i32
    %c0_i32_0 = arith.constant 0 : i32
    %c0_i32_1 = arith.constant 0 : i32
    return %c0_i32, %c0_i32_0 : i32, i32
  }
  func.func @transform_3(%arg0: i32) -> (i32, i32) {
    %c0_i32 = arith.constant 0 : i32
    %c0_i32_0 = arith.constant 0 : i32
    %c0_i32_1 = arith.constant 0 : i32
    return %c0_i32, %c0_i32_0 : i32, i32
  }
  func.func @transform_4(%arg0: i32) -> (i32, i32) {
    %c0_i32 = arith.constant 0 : i32
    %c0_i32_0 = arith.constant 0 : i32
    %c0_i32_1 = arith.constant 0 : i32
    return %c0_i32, %c0_i32_0 : i32, i32
  }
}

</mosaic_0001>

<bundles_post_ra>
// kernel: tpu_custom_call.1
= control target key start
LH: loop header
LB: loop body
LE: loop exit
PB: predicated region body
PF: predicated region fallthrough
CT: control target
= control target key end

     0   :  { %10 = vsyncpa [#allocation3], 0  ;;  %s499_s0 = inlined_call_operand.vmem [shape: f32[2,256], index: 0, kind: input, shape index: {}]   ;;  %s500_s1 = inlined_call_operand.vmem [shape: f32[256,8], index: 1, kind: input, shape index: {}]   ;;  %s501_s2 = inlined_call_operand.vmem [shape: f32[8,32], index: 2, kind: input, shape index: {}]   ;;  %s502_s3 = inlined_call_operand.hbm [shape: f32[2,8], index: 3, kind: output, shape index: {0}]   ;;  %s503_s4 = inlined_call_operand.hbm [shape: f32[2,32], index: 4, kind: output, shape index: {1}]  }
   0x1   :  { %v57_v0 = vld [vmem:[%s500_s1 + $0xf8] sm:$0xff]  ;;  %v56_v2 = vld [vmem:[%s500_s1 + $0xf0] sm:$0xff]  ;;  %v55_v4 = vld [vmem:[%s500_s1 + $0xe8] sm:$0xff] }
   0x2   :  { %v41_v1 = vld [vmem:[%s500_s1 + $0x78] sm:$0xff]  ;;  %266 = vmatprep.subr.mxu0 %v57_v0  ;;  %v40_v3 = vld [vmem:[%s500_s1 + $0x70] sm:$0xff]  ;;  %v39_v5 = vld [vmem:[%s500_s1 + $0x68] sm:$0xff] }
   0x3   :  { %267 = vmatpush3.msra.mxu0 %v41_v1  ;;  %v54_v6 = vld [vmem:[%s500_s1 + $0xe0] sm:$0xff]  ;;  %v53_v8 = vld [vmem:[%s500_s1 + $0xd8] sm:$0xff]  ;;  %v52_v10 = vld [vmem:[%s500_s1 + $0xd0] sm:$0xff] }
   0x4   :  { %268 = vmatprep.subr.mxu0 %v56_v2  ;;  %v38_v7 = vld [vmem:[%s500_s1 + $0x60] sm:$0xff]  ;;  %v37_v9 = vld [vmem:[%s500_s1 + $0x58] sm:$0xff]  ;;  %v36_v11 = vld [vmem:[%s500_s1 + $0x50] sm:$0xff] }
   0x5   :  { %269 = vmatpush3.msra.mxu0 %v40_v3  ;;  %v51_v12 = vld [vmem:[%s500_s1 + $0xc8] sm:$0xff]  ;;  %v263_v13 = vld.sshfl [vmem:[%s499_s0] sm:$0x33 pattern:$0x76325410] }
   0x6   :  { %270 = vmatprep.subr.mxu0 %v55_v4  ;;  %v35_v14 = vld [vmem:[%s500_s1 + $0x48] sm:$0xff]  ;;  %v66_v15 = vcombine.high %v263_v13, %v263_v13 }
   0x7   :  { %271 = vmatpush3.msra.mxu0 %v39_v5 }
   0x8   :  { %272 = vmatprep.subr.mxu0 %v54_v6 }
   0x9   :  { %273 = vmatpush3.msra.mxu0 %v38_v7 }
   0xa   :  { %274 = vmatprep.subr.mxu0 %v53_v8 }
   0xb   :  { %275 = vmatpush3.msra.mxu0 %v37_v9 }
   0xc   :  { %276 = vmatprep.subr.mxu0 %v52_v10 }
   0xd   :  { %11 = vsyncpa [#allocation5], 0  ;;  %277 = vmatpush3.msra.mxu0 %v36_v11  ;;  %v50_v16 = vld [vmem:[%s500_s1 + $0xc0] sm:$0xff]  ;;  %133 = vmatprep.mubr.f32.mxu0 %v66_v15  ;;  %v49_v18 = vld [vmem:[%s500_s1 + $0xb8] sm:$0xff]  ;;  %vm22_vm0 = vcmask 58368   ;;  %v362_v34 = vmov 0.0  }
   0xe   :  { %278 = vmatprep.subr.mxu0 %v51_v12  ;;  %v34_v17 = vld [vmem:[%s500_s1 + $0x40] sm:$0xff]  ;;  %v33_v19 = vld [vmem:[%s500_s1 + $0x38] sm:$0xff]  ;;  %v48_v20 = vld [vmem:[%s500_s1 + $0xb0] sm:$0xff]  ;;  %23 = vst.msk [vmem:[#allocation2] sm:$0x3] %vm22_vm0, %v362_v34  ;;  %303 = vmatprep.subr.mxu1 %v362_v34  ;;  %vm363_vm1 = vmmov 0  }
   0xf   :  { %279 = vmatpush3.msra.mxu0 %v35_v14  ;;  %v32_v21 = vld [vmem:[%s500_s1 + $0x30] sm:$0xff]  ;;  %v47_v22 = vld [vmem:[%s500_s1 + $0xa8] sm:$0xff]  ;;  %v46_v24 = vld [vmem:[%s500_s1 + $0xa0] sm:$0xff]  ;;  %305 = vmatprep.mubr.msk.f32.mxu1 %vm363_vm1, %v362_v34  ;;  %vm147_vm2 = vcmask 64512  }
  0x10   :  { %280 = vmatprep.subr.mxu0 %v50_v16  ;;  %v31_v23 = vld [vmem:[%s500_s1 + $0x28] sm:$0xff]  ;;  %v30_v25 = vld [vmem:[%s500_s1 + $0x20] sm:$0xff]  ;;  %v45_v26 = vld [vmem:[%s500_s1 + $0x98] sm:$0xff] }
  0x11   :  { %281 = vmatpush3.msra.mxu0 %v34_v17  ;;  %v29_v27 = vld [vmem:[%s500_s1 + $0x18] sm:$0xff]  ;;  %v44_v28 = vld [vmem:[%s500_s1 + $0x90] sm:$0xff]  ;;  %v43_v30 = vld [vmem:[%s500_s1 + $0x88] sm:$0xff] }
  0x12   :  { %282 = vmatprep.subr.mxu0 %v49_v18  ;;  %v28_v29 = vld [vmem:[%s500_s1 + $0x10] sm:$0xff]  ;;  %v27_v31 = vld [vmem:[%s500_s1 + $0x8] sm:$0xff]  ;;  %v42_v32 = vld [vmem:[%s500_s1 + $0x80] sm:$0xff] }
  0x13   :  { %283 = vmatpush3.msra.mxu0 %v33_v19  ;;  %v26_v33 = vld [vmem:[%s500_s1] sm:$0xff]  ;;  %s364_s1 = smov [#allocation2]  }
  0x14   :  { %284 = vmatprep.subr.mxu0 %v48_v20  ;;  %v146_v35 = vld [vmem:[%s501_s2] sm:$0xff]  ;;  %s241_s29 = sshll.u32 %s364_s1, 4  ;;  %s242_s29 = int_to_ptr.vmem [resolvable:$true] %s241_s29 }
  0x15   :  { %285 = vmatpush3.msra.mxu0 %v32_v21  ;;  %304 = vmatpush3.msra.mxu1 %v146_v35  ;;  %v24_v38 = vld [vmem:[#allocation2] sm:$0x3]  ;;  %s318_s30 = scalar_lea.vmem %s242_s29, 32  ;;  %p323_p1 = scmp.lt.s32.totalorder %s242_s29, %s242_s29 }
  0x16   :  { %286 = vmatprep.subr.mxu0 %v47_v22  ;;  %p319_p0 = scmp.ne.s32.totalorder %s242_s29, %s318_s30  ;;  %p324_p2 = scmp.lt.s32.totalorder %s318_s30, %s318_s30 }
  0x17   :  { %287 = vmatpush3.msra.mxu0 %v31_v23 }
  0x18   :  { %288 = vmatprep.subr.mxu0 %v46_v24  ;;  %p325_p3 = por %p324_p2, %p323_p1 }
  0x19   :  { %289 = vmatpush3.msra.mxu0 %v30_v25 }
  0x1a   :  { %290 = vmatprep.subr.mxu0 %v45_v26  ;;  %p326_p4 = pnand %p325_p3, %p319_p0 }
  0x1b   :  { %291 = vmatpush3.msra.mxu0 %v29_v27 }
  0x1c   :  { %292 = vmatprep.subr.mxu0 %v44_v28 }
  0x1d   :  { %293 = vmatpush3.msra.mxu0 %v28_v29 }
  0x1e   :  { %294 = vmatprep.subr.mxu0 %v43_v30 }
  0x1f   :  { %295 = vmatpush3.msra.mxu0 %v27_v31 }
  0x20   :  { %296 = vmatprep.subr.mxu0 %v42_v32 }
  0x21   :  { %297 = vmatpush3.msra.mxu0 %v26_v33 }
  0x22   :  { %134 = vmatmul.mubr.f32.vlgmr.msra.gmra.mxu0 %v263_v13 }
  0xe2   :  { %v298_v36 = vpop.f32.mrf.mxu0 }
  0xe4   :  { %v299_v37 = vpop.f32.mrf.mxu0 }
  0xe5   :  { %v300_v39 = vadd.f32 %v299_v37, %v298_v36 }
  0xe7   :  { %v139_v40 = vadd.f32 %v300_v39, %v24_v38 }
  0xe9   :  { %141 = vst.msk [vmem:[#allocation2] sm:$0x3] %vm22_vm0, %v139_v40 }
  0xf0   :  { %v145_v41 = vld [vmem:[#allocation2] sm:$0x3] }
  0xf1   :  { %306 = vmatmul.mubr.msk.f32.vlgmr.msra.gmra.mxu1 %vm147_vm2, %v145_v41 }
  0xf2   :  { %329 = shalt.err (!%p326_p4)
}
  0xf3   :  { %244 = dma.vmem_to_hbm [thread:$0]  %s242_s29, 32, %s502_s3, [#allocation3]   ;;  %vm233_vm3 = vcmask 254976  }
  0xf4   :  { %s365_s6 = smov [#allocation4]  }
  0xf5   :  { %s251_s7 = sshll.u32 %s365_s6, 4  ;;  %s252_s7 = int_to_ptr.vmem [resolvable:$true] %s251_s7 }
  0xf6   :  { %s338_s3 = scalar_lea.vmem %s252_s7, 32  ;;  %p343_p6 = scmp.lt.s32.totalorder %s252_s7, %s252_s7 }
  0xf7   :  { %p339_p5 = scmp.ne.s32.totalorder %s252_s7, %s338_s3  ;;  %p344_p7 = scmp.lt.s32.totalorder %s338_s3, %s338_s3 }
  0xf9   :  { %p345_p8 = por %p344_p7, %p343_p6 }
  0xfb   :  { %p346_p9 = pnand %p345_p8, %p339_p5 }
 0x1b1   :  { %v217_v42 = vpop.f32.mrf.mxu1 }
 0x1b2   :  { %v265_v43 = vmul.f32 -1.442695, %v217_v42 }
 0x1b3   :  { %v307_v44 = vpop.f32.mrf.mxu1 }
 0x1b4   :  { %312 = vpow2.f32 %v265_v43 }
 0x1c1   :  { %v313_v45 = vpop.eup %312 }
 0x1c2   :  { %v224_v46 = vadd.f32 1.0, %v313_v45 }
 0x1c4   :  { %314 = vrcp.f32 %v224_v46 }
 0x1d1   :  { %v315_v47 = vpop.eup %314 }
 0x1d2   :  { %v227_v48 = vmul.f32 0.0033333334, %v315_v47 }
 0x1d4   :  { %v228_v49 = vadd.f32 0.013333334, %v227_v48 }
 0x1d6   :  { %v229_v50 = vmul.f32 5.0, %v228_v49 }
 0x1d8   :  { %v230_v51 = vmul.f32 %v229_v50, %v229_v50 }
 0x1da   :  { %316 = vrcp.f32 %v230_v51 }
 0x1e7   :  { %v317_v52 = vpop.eup %316 }
 0x1e8   :  { %234 = vst.msk [vmem:[#allocation4] sm:$0x3] %vm233_vm3, %v317_v52 }
 0x1e9   :  { %349 = shalt.err (!%p346_p9)
}
 0x1ea   :  { %254 = dma.vmem_to_hbm [thread:$0]  %s252_s7, 32, %s503_s4, [#allocation5]  }
 0x1eb   :  { %358 = dma.done.wait [#allocation3], 32  }
 0x1ec   :  { %359 = vsyncadd [#allocation3], 4294967264 }
 0x1ed   :  { %360 = dma.done.wait [#allocation5], 32  }
 0x1ee   :  { %361 = vsyncadd [#allocation5], 4294967264 }
 0x1ef   :  { %261 = vsyncpa [#allocation3], 1 }
 0x1f0   :  { %262 = vsyncpa [#allocation5], 1 }

</bundles_post_ra>
